<compile_context>
chip_gen: v7x
topology: tpu7x:2x2x1
jax: 0.10.0
libtpu: 0.0.40
codegen_flags: <defaults>
</compile_context>

<pallas_src>
import math

import jax
import jax.numpy as jnp
from jax.experimental import pallas as pl
from jax.experimental.pallas import tpu as pltpu


def mnist_mlp_kernel(x_ref, w1_ref, b1_ref, w2_ref, b2_ref, out_ref):
    # Cast the streamed f32 tile to bf16 in-kernel (VPU has slack; avoids a separate
    # HBM convert pass in the wrapper).
    x = x_ref[...].astype(jnp.bfloat16)
    # fc1 + ReLU (bf16 MXU pass, f32 accumulate)
    h = jnp.dot(x, w1_ref[...], preferred_element_type=jnp.float32)
    h = jnp.maximum(h + b1_ref[...], 0.0)                      # (TB,128) + (1,128)
    # fc2 (cast activations back to bf16 for a dense bf16 MXU pass)
    logits = jnp.dot(h.astype(jnp.bfloat16), w2_ref[...],
                     preferred_element_type=jnp.float32)
    logits = logits + b2_ref[...]                              # (TB,10) + (1,10)
    # log_softmax along the last axis, numerically stable, all in f32
    m = jnp.max(logits, axis=-1, keepdims=True)
    shifted = logits - m
    lse = jnp.log(jnp.sum(jnp.exp(shifted), axis=-1, keepdims=True))
    out_ref[...] = (shifted - lse).astype(out_ref.dtype)


def mnist_net_forward(x, w1, b1, w2, b2, *, block_rows=2048):
    """x: (B, 784) f32; w1: (784, 100); b1: (1, 100); w2: (100, 10); b2: (1, 10)."""
    B, K = x.shape
    H = w1.shape[1]
    O = w2.shape[1]

    # --- pad hidden dim to a multiple of 128 (dense MXU / vreg tiles, no masking).
    #     Only the tiny weight/bias tensors are padded; x is never padded or copied. ---
    HP = ((H + 127) // 128) * 128
    if HP != H:
        w1 = jnp.pad(w1, ((0, 0), (0, HP - H)))
        b1 = jnp.pad(b1, ((0, 0), (0, HP - H)))
        w2 = jnp.pad(w2, ((0, HP - H), (0, 0)))

    # Weights in bf16 (VMEM-resident, read once); biases stay f32; x stays f32 in HBM
    # and is cast inside the kernel.
    w1b = w1.astype(jnp.bfloat16)
    w2b = w2.astype(jnp.bfloat16)
    b1f = b1.astype(jnp.float32)
    b2f = b2.astype(jnp.float32)
    xf = x.astype(jnp.float32)

    # --- batch tile: multiple of 8 sublanes, capped at block_rows.
    #     No batch padding: Pallas clips the ragged trailing tile's DMAs. ---
    TB = min(block_rows, ((B + 7) // 8) * 8)
    grid = (pl.cdiv(B, TB),)

    cost = pl.CostEstimate(
        flops=2 * B * (K * HP + HP * O),
        transcendentals=B * O,
        bytes_accessed=xf.size * 4                      # x read once, f32
                       + (w1b.size + w2b.size) * 2      # weights once, bf16
                       + (b1f.size + b2f.size) * 4      # biases once, f32
                       + B * O * 4,                     # output once, f32
    )

    out = pl.pallas_call(
        mnist_mlp_kernel,
        out_shape=jax.ShapeDtypeStruct((B, O), jnp.float32),
        grid=grid,
        in_specs=[
            pl.BlockSpec((TB, K), lambda i: (i, 0)),    # x: streamed per batch tile (f32)
            pl.BlockSpec((K, HP), lambda i: (0, 0)),    # w1: VMEM-resident
            pl.BlockSpec((1, HP), lambda i: (0, 0)),    # b1
            pl.BlockSpec((HP, O), lambda i: (0, 0)),    # w2
            pl.BlockSpec((1, O), lambda i: (0, 0)),     # b2
        ],
        out_specs=pl.BlockSpec((TB, O), lambda i: (i, 0)),
        compiler_params=pltpu.CompilerParams(
            dimension_semantics=("parallel",),          # megacore sharding on v7x
            # Double-buffered f32 x at TB=2048 is ~12.8 MiB; 32 MiB fits that on every
            # generation (raises v5e's 16 MiB default, stays under v7x's 64 MiB physical).
            vmem_limit_bytes=32 * 1024 * 1024,
        ),
        cost_estimate=cost,
    )(xf, w1b, b1f, w2b, b2f)
    return out


def init_params(key):
    k1, k2, k3, k4 = jax.random.split(key, 4)
    in1, out1 = 28 * 28, 100
    in2, out2 = 100, 10
    # fc1.weight: xavier_uniform_ (gain=1): bound = sqrt(6/(fan_in+fan_out))
    bnd1 = math.sqrt(6.0 / (in1 + out1))
    w1 = jax.random.uniform(k1, (in1, out1), jnp.float32, -bnd1, bnd1)
    # fc1.bias: PyTorch Linear default: U(-1/sqrt(fan_in), 1/sqrt(fan_in))
    bb1 = 1.0 / math.sqrt(in1)
    b1 = jax.random.uniform(k2, (1, out1), jnp.float32, -bb1, bb1)
    # fc2: PyTorch Linear default init (kaiming-uniform weight bound = 1/sqrt(fan_in))
    bw2 = 1.0 / math.sqrt(in2)
    w2 = jax.random.uniform(k3, (in2, out2), jnp.float32, -bw2, bw2)
    bb2 = 1.0 / math.sqrt(in2)
    b2 = jax.random.uniform(k4, (1, out2), jnp.float32, -bb2, bb2)
    return w1, b1, w2, b2


if __name__ == "__main__":
    key = jax.random.PRNGKey(0)
    kx, kp = jax.random.split(key)
    B = 8
    x = jax.random.normal(kx, (B, 28 * 28), jnp.float32)
    w1, b1, w2, b2 = init_params(kp)

    out = mnist_net_forward(x, w1, b1, w2, b2)
    out = jax.block_until_ready(out)

    # Reference in plain JAX with the same bf16-input / f32-accumulate arithmetic.
    xb = x.astype(jnp.bfloat16)
    w1b = w1.astype(jnp.bfloat16)
    w2b = w2.astype(jnp.bfloat16)
    h_ref = jnp.maximum(
        jnp.dot(xb, w1b, preferred_element_type=jnp.float32) + b1, 0.0)
    logits_ref = jnp.dot(h_ref.astype(jnp.bfloat16), w2b,
                         preferred_element_type=jnp.float32) + b2
    ref = jax.nn.log_softmax(logits_ref, axis=1)

    assert out.shape == (B, 10)
    assert bool(jnp.all(jnp.isfinite(out)))
    assert jnp.allclose(out, ref, atol=1e-4, rtol=1e-4)

    print("KERNEL_OK")
</pallas_src>

<mosaic_0001>
module attributes {stable_mosaic.version = 11 : i64} {
  func.func @mnist_mlp_kernel(%arg0: i32, %arg1: memref<8x784xf32, #tpu.memory_space<vmem>>, %arg2: memref<784x128xbf16, #tpu.memory_space<vmem>>, %arg3: memref<1x128xf32, #tpu.memory_space<vmem>>, %arg4: memref<128x10xbf16, #tpu.memory_space<vmem>>, %arg5: memref<1x10xf32, #tpu.memory_space<vmem>>, %arg6: memref<8x10xf32, #tpu.memory_space<vmem>>) attributes {dimension_semantics = [#tpu.dimension_semantics<parallel>], iteration_bounds = array<i64: 1>, scalar_prefetch = 0 : i64, scratch_operands = 0 : i64, tpu.core_type = #tpu.core_type<tc>, window_params = [{transform_indices = @transform_0, window_bounds = array<i64: 8, 784>}, {pipeline_mode = #tpu.pipeline_mode<synchronous>, transform_indices = @transform_1, window_bounds = array<i64: 784, 128>}, {pipeline_mode = #tpu.pipeline_mode<synchronous>, transform_indices = @transform_2, window_bounds = array<i64: 1, 128>}, {pipeline_mode = #tpu.pipeline_mode<synchronous>, transform_indices = @transform_3, window_bounds = array<i64: 128, 10>}, {pipeline_mode = #tpu.pipeline_mode<synchronous>, transform_indices = @transform_4, window_bounds = array<i64: 1, 10>}, {transform_indices = @transform_5, window_bounds = array<i64: 8, 10>}]} {
    %c0 = arith.constant 0 : index
    %c0_0 = arith.constant 0 : index
    %0 = vector.load %arg1[%c0, %c0_0] : memref<8x784xf32, #tpu.memory_space<vmem>>, vector<8x784xf32>
    %1 = arith.truncf %0 : vector<8x784xf32> to vector<8x784xbf16>
    %c0_1 = arith.constant 0 : index
    %c0_2 = arith.constant 0 : index
    %2 = vector.load %arg2[%c0_1, %c0_2] : memref<784x128xbf16, #tpu.memory_space<vmem>>, vector<784x128xbf16>
    %cst = arith.constant dense<0.000000e+00> : vector<8x128xf32>
    %3 = tpu.matmul %1, %2, %cst {dimension_numbers = #tpu.dot_dimension_numbers<[1], [0], [0], [1], [0, 0, 1, 1], [], []>} : vector<8x784xbf16>, vector<784x128xbf16>, vector<8x128xf32> -> vector<8x128xf32>
    %c0_3 = arith.constant 0 : index
    %c0_4 = arith.constant 0 : index
    %4 = vector.load %arg3[%c0_3, %c0_4] : memref<1x128xf32, #tpu.memory_space<vmem>>, vector<1x128xf32>
    %5 = vector.broadcast %4 : vector<1x128xf32> to vector<8x128xf32>
    %6 = arith.addf %3, %5 : vector<8x128xf32>
    %cst_5 = arith.constant 0.000000e+00 : f32
    %7 = vector.broadcast %cst_5 : f32 to vector<8x128xf32>
    %8 = arith.maximumf %6, %7 : vector<8x128xf32>
    %9 = arith.truncf %8 : vector<8x128xf32> to vector<8x128xbf16>
    %c0_6 = arith.constant 0 : index
    %c0_7 = arith.constant 0 : index
    %10 = vector.load %arg4[%c0_6, %c0_7] : memref<128x10xbf16, #tpu.memory_space<vmem>>, vector<128x10xbf16>
    %cst_8 = arith.constant dense<0.000000e+00> : vector<8x10xf32>
    %11 = tpu.matmul %9, %10, %cst_8 {dimension_numbers = #tpu.dot_dimension_numbers<[1], [0], [0], [1], [0, 0, 1, 1], [], []>} : vector<8x128xbf16>, vector<128x10xbf16>, vector<8x10xf32> -> vector<8x10xf32>
    %c0_9 = arith.constant 0 : index
    %c0_10 = arith.constant 0 : index
    %12 = vector.load %arg5[%c0_9, %c0_10] : memref<1x10xf32, #tpu.memory_space<vmem>>, vector<1x10xf32>
    %13 = vector.broadcast %12 : vector<1x10xf32> to vector<8x10xf32>
    %14 = arith.addf %11, %13 : vector<8x10xf32>
    %cst_11 = arith.constant dense<0xFF800000> : vector<8xf32>
    %15 = vector.multi_reduction <maximumf>, %14, %cst_11 [1] : vector<8x10xf32> to vector<8xf32>
    %16 = vector.shape_cast %15 : vector<8xf32> to vector<8x1xf32>
    %17 = vector.broadcast %16 : vector<8x1xf32> to vector<8x10xf32>
    %18 = arith.subf %14, %17 : vector<8x10xf32>
    %19 = math.exp %18 : vector<8x10xf32>
    %cst_12 = arith.constant dense<0.000000e+00> : vector<8xf32>
    %20 = vector.multi_reduction <add>, %19, %cst_12 [1] : vector<8x10xf32> to vector<8xf32>
    %21 = vector.shape_cast %20 : vector<8xf32> to vector<8x1xf32>
    %22 = math.log %21 : vector<8x1xf32>
    %23 = vector.broadcast %22 : vector<8x1xf32> to vector<8x10xf32>
    %24 = arith.subf %18, %23 : vector<8x10xf32>
    %c0_13 = arith.constant 0 : index
    %c0_14 = arith.constant 0 : index
    %25 = vector.load %arg6[%c0_13, %c0_14] : memref<8x10xf32, #tpu.memory_space<vmem>>, vector<8x10xf32>
    tpu.vector_store %arg6[%c0_13, %c0_14], %24 {strides = array<i32>} : memref<8x10xf32, #tpu.memory_space<vmem>>, vector<8x10xf32>,
    return
  }
  func.func @transform_0(%arg0: i32) -> (i32, i32) {
    %c0_i32 = arith.constant 0 : i32
    %c0_i32_0 = arith.constant 0 : i32
    return %arg0, %c0_i32 : i32, i32
  }
  func.func @transform_1(%arg0: i32) -> (i32, i32) {
    %c0_i32 = arith.constant 0 : i32
    %c0_i32_0 = arith.constant 0 : i32
    %c0_i32_1 = arith.constant 0 : i32
    return %c0_i32, %c0_i32_0 : i32, i32
  }
  func.func @transform_2(%arg0: i32) -> (i32, i32) {
    %c0_i32 = arith.constant 0 : i32
    %c0_i32_0 = arith.constant 0 : i32
    %c0_i32_1 = arith.constant 0 : i32
    return %c0_i32, %c0_i32_0 : i32, i32
  }
  func.func @transform_3(%arg0: i32) -> (i32, i32) {
    %c0_i32 = arith.constant 0 : i32
    %c0_i32_0 = arith.constant 0 : i32
    %c0_i32_1 = arith.constant 0 : i32
    return %c0_i32, %c0_i32_0 : i32, i32
  }
  func.func @transform_4(%arg0: i32) -> (i32, i32) {
    %c0_i32 = arith.constant 0 : i32
    %c0_i32_0 = arith.constant 0 : i32
    %c0_i32_1 = arith.constant 0 : i32
    return %c0_i32, %c0_i32_0 : i32, i32
  }
  func.func @transform_5(%arg0: i32) -> (i32, i32) {
    %c0_i32 = arith.constant 0 : i32
    %c0_i32_0 = arith.constant 0 : i32
    return %arg0, %c0_i32 : i32, i32
  }
}

</mosaic_0001>

<bundles_post_ra>
// kernel: tpu_custom_call.1
= control target key start
LH: loop header
LB: loop body
LE: loop exit
PB: predicated region body
PF: predicated region fallthrough
CT: control target
= control target key end

     0   :  { %10 = vsyncpa [#allocation3], 0  ;;  %s1160_s0 = inlined_call_operand.vmem [shape: f32[8,784], index: 0, kind: input, shape index: {}]   ;;  %s1161_s1 = inlined_call_operand.hbm [shape: bf16[784,128], index: 1, kind: input, shape index: {}]   ;;  %s1162_s2 = inlined_call_operand.vmem [shape: f32[1,128], index: 2, kind: input, shape index: {}]   ;;  %s1163_s3 = inlined_call_operand.vmem [shape: bf16[128,10], index: 3, kind: input, shape index: {}]   ;;  %s1164_s4 = inlined_call_operand.vmem [shape: f32[1,10], index: 4, kind: input, shape index: {}]   ;;  %s1165_s5 = inlined_call_operand.hbm [shape: f32[8,10], index: 5, kind: output, shape index: {}]  }
   0x1   :  { %11 = vsyncpa [#allocation4], 0  ;;  %s1033_s18 = smov [#allocation2]   ;;  %s985_s22 = scalar_lea.hbm %s1161_s1, 6272 }
   0x2   :  { %s19_s19 = sshll.u32 %s1033_s18, 4  ;;  %p986_p0 = scmp.ne.s32.totalorder %s1161_s1, %s985_s22  ;;  %s20_s19 = int_to_ptr.vmem [resolvable:$true] %s19_s19 }
   0x3   :  { %p989_p1 = scmp.lt.u32.totalorder %s985_s22, %s1161_s1 }
   0x5   :  { %p991_p2 = pnand %p989_p1, %p986_p0 }
   0x7   :  { %994 = shalt.err (!%p991_p2)
}
   0x8   :  { %s995_s27 = scalar_lea.vmem %s20_s19, 6272  ;;  %p1000_p4 = scmp.lt.s32.totalorder %s20_s19, %s20_s19 }
   0x9   :  { %p996_p3 = scmp.ne.s32.totalorder %s20_s19, %s995_s27  ;;  %p1001_p5 = scmp.lt.s32.totalorder %s995_s27, %s995_s27 }
   0xb   :  { %p1002_p6 = por %p1001_p5, %p1000_p4 }
   0xd   :  { %p1003_p7 = pnand %p1002_p6, %p996_p3 }
   0xf   :  { %1006 = shalt.err (!%p1003_p7)
}
  0x10   :  { %s1034_s28 = smov 64   ;;  %s1035_s29 = smov 4  }
  0x11   :  { %25 = dma.hbm_to_vmem [thread:$0]  %s1161_s1, 6272, %s20_s19, [#allocation3], %s1034_s28, %s1034_s28, %s1035_s29  }
  0x12   :  { %1029 = dma.done.wait [#allocation3], 6272  }
  0x13   :  { %1030 = vsyncadd [#allocation3], 4294961024  ;;  %v924_v0 = vld [vmem:[#allocation2 + $0x40] sm:$0xff]   ;;  %v928_v4 = vld [vmem:[#allocation2 + $0x48] sm:$0xff]   ;;  %v1036_v44 = vmov 0.0   ;;  %vm1037_vm0 = vmmov 0  }
  0x14   :  { %v925_v1 = vld [vmem:[#allocation2] sm:$0xff]   ;;  %815 = vmatprep.subr.bf16.mxu0 %v924_v0  ;;  %v929_v5 = vld [vmem:[#allocation2 + $0x8] sm:$0xff]   ;;  %v932_v8 = vld [vmem:[#allocation2 + $0x50] sm:$0xff]   ;;  %vm449_vm1 = vcmask 130048   ;;  %vm726_vm2 = vcmask 80896  }
  0x15   :  { %v926_v2 = vld [vmem:[#allocation2 + $0xc0] sm:$0xff]   ;;  %816 = vmatpush3.bf16.msra.mxu0 %v925_v1  ;;  %v930_v6 = vld [vmem:[#allocation2 + $0xc8] sm:$0xff]   ;;  %v933_v9 = vld [vmem:[#allocation2 + $0x10] sm:$0xff]  }
  0x16   :  { %v927_v3 = vld [vmem:[#allocation2 + $0x80] sm:$0xff]   ;;  %837 = vmatprep.subr.bf16.mxu1 %v926_v2  ;;  %817 = vmatprep.subr.bf16.mxu0 %v928_v4  ;;  %v931_v7 = vld [vmem:[#allocation2 + $0x88] sm:$0xff]   ;;  %v934_v10 = vld [vmem:[#allocation2 + $0xd0] sm:$0xff]  }
  0x17   :  { %838 = vmatpush3.bf16.msra.mxu1 %v927_v3  ;;  %v935_v11 = vld [vmem:[#allocation2 + $0x90] sm:$0xff]   ;;  %v936_v12 = vld [vmem:[#allocation2 + $0x58] sm:$0xff]   ;;  %v940_v16 = vld [vmem:[#allocation2 + $0x60] sm:$0xff]  }
  0x18   :  { %839 = vmatprep.subr.bf16.mxu1 %v930_v6  ;;  %v937_v13 = vld [vmem:[#allocation2 + $0x18] sm:$0xff]   ;;  %v941_v17 = vld [vmem:[#allocation2 + $0x20] sm:$0xff]   ;;  %v944_v20 = vld [vmem:[#allocation2 + $0x68] sm:$0xff]  }
  0x19   :  { %818 = vmatpush3.bf16.msra.mxu0 %v929_v5  ;;  %v938_v14 = vld [vmem:[#allocation2 + $0xd8] sm:$0xff]   ;;  %v942_v18 = vld [vmem:[#allocation2 + $0xe0] sm:$0xff]   ;;  %v945_v21 = vld [vmem:[#allocation2 + $0x28] sm:$0xff]  }
  0x1a   :  { %819 = vmatprep.subr.bf16.mxu0 %v932_v8  ;;  %v939_v15 = vld [vmem:[#allocation2 + $0x98] sm:$0xff]   ;;  %v943_v19 = vld [vmem:[#allocation2 + $0xa0] sm:$0xff]   ;;  %v946_v22 = vld [vmem:[#allocation2 + $0xe8] sm:$0xff]  }
  0x1b   :  { %840 = vmatpush3.bf16.msra.mxu1 %v931_v7  ;;  %v947_v23 = vld [vmem:[#allocation2 + $0xa8] sm:$0xff]   ;;  %v948_v24 = vld [vmem:[#allocation2 + $0x70] sm:$0xff]   ;;  %v952_v28 = vld [vmem:[#allocation2 + $0x78] sm:$0xff]  }
  0x1c   :  { %841 = vmatprep.subr.bf16.mxu1 %v934_v10  ;;  %v949_v25 = vld [vmem:[#allocation2 + $0x30] sm:$0xff]   ;;  %v953_v29 = vld [vmem:[#allocation2 + $0x38] sm:$0xff]   ;;  %v37_v31 = vld [vmem:[%s1160_s0 + $0x8] sm:$0xff] }
  0x1d   :  { %820 = vmatpush3.bf16.msra.mxu0 %v933_v9  ;;  %v950_v26 = vld [vmem:[#allocation2 + $0xf0] sm:$0xff]   ;;  %v954_v30 = vld [vmem:[#allocation2 + $0xf8] sm:$0xff]   ;;  %v44_v32 = vpack.c.bf16 %v37_v31, %v37_v31  ;;  %v36_v34 = vld [vmem:[%s1160_s0] sm:$0xff] }
  0x1e   :  { %821 = vmatprep.subr.bf16.mxu0 %v936_v12  ;;  %v951_v27 = vld [vmem:[#allocation2 + $0xb0] sm:$0xff]   ;;  %v955_v33 = vld [vmem:[#allocation2 + $0xb8] sm:$0xff]   ;;  %v43_v35 = vpack.c.bf16 %v36_v34, %v36_v34  ;;  %v956_v36 = vld [vmem:[#allocation2 + $0x140] sm:$0xff]  }
  0x1f   :  { %842 = vmatpush3.bf16.msra.mxu1 %v935_v11  ;;  %v39_v37 = vld [vmem:[%s1160_s0 + $0x18] sm:$0xff]  ;;  %485 = vmatprep.mubr.bf16.mxu0 %v44_v32  ;;  %v957_v39 = vld [vmem:[#allocation2 + $0x100] sm:$0xff]   ;;  %v38_v40 = vld [vmem:[%s1160_s0 + $0x10] sm:$0xff] }
  0x20   :  { %843 = vmatprep.subr.bf16.mxu1 %v938_v14  ;;  %v46_v38 = vpack.c.bf16 %v39_v37, %v39_v37  ;;  %v45_v41 = vpack.c.bf16 %v38_v40, %v38_v40  ;;  %v958_v42 = vld [vmem:[#allocation2 + $0x148] sm:$0xff]   ;;  %v960_v45 = vld [vmem:[#allocation2 + $0x150] sm:$0xff]   ;;  %v962_v47 = vld [vmem:[#allocation2 + $0x158] sm:$0xff]  }
  0x21   :  { %822 = vmatpush3.bf16.msra.mxu0 %v937_v13  ;;  %v959_v43 = vld [vmem:[#allocation2 + $0x108] sm:$0xff]   ;;  %v961_v46 = vld [vmem:[#allocation2 + $0x110] sm:$0xff]   ;;  %v963_v48 = vld [vmem:[#allocation2 + $0x118] sm:$0xff]  }
  0x22   :  { %823 = vmatprep.subr.bf16.mxu0 %v940_v16  ;;  %525 = vmatprep.mubr.bf16.mxu1 %v46_v38  ;;  %v964_v49 = vld [vmem:[#allocation2 + $0x160] sm:$0xff]   ;;  %v966_v51 = vld [vmem:[#allocation2 + $0x168] sm:$0xff]   ;;  %v968_v55 = vld [vmem:[#allocation2 + $0x170] sm:$0xff]  }
  0x23   :  { %844 = vmatpush3.bf16.msra.mxu1 %v939_v15  ;;  %v965_v50 = vld [vmem:[#allocation2 + $0x120] sm:$0xff]   ;;  %v967_v52 = vld [vmem:[#allocation2 + $0x128] sm:$0xff]   ;;  %v42_v57 = vld [vmem:[%s1160_s0 + $0x30] sm:$0xff] }
  0x24   :  { %845 = vmatprep.subr.bf16.mxu1 %v942_v18  ;;  %v972_v53 = vld [vmem:[#allocation2 + $0x180] sm:$0xff]   ;;  %v41_v54 = vld [vmem:[%s1160_s0 + $0x28] sm:$0xff]  ;;  %v49_v58 = vpack.c.bf16 %v42_v57, %v42_v57  ;;  %v969_v59 = vld [vmem:[#allocation2 + $0x130] sm:$0xff]  }
  0x25   :  { %824 = vmatpush3.bf16.msra.mxu0 %v941_v17  ;;  %v48_v56 = vpack.c.bf16 %v41_v54, %v41_v54  ;;  %v970_v60 = vld [vmem:[#allocation2 + $0x178] sm:$0xff]   ;;  %v40_v62 = vld [vmem:[%s1160_s0 + $0x20] sm:$0xff]  ;;  %v974_v1 = vld [vmem:[%s1163_s3 + $0x8] sm:$0xff]  }
  0x26   :  { %825 = vmatprep.subr.bf16.mxu0 %v944_v20  ;;  %v971_v61 = vld [vmem:[#allocation2 + $0x138] sm:$0xff]   ;;  %v47_v63 = vpack.c.bf16 %v40_v62, %v40_v62  ;;  %v973_v0 = vld [vmem:[%s1163_s3] sm:$0xff]   ;;  %v975_v2 = vld [vmem:[%s1163_s3 + $0x10] sm:$0xff]  }
  0x27   :  { %846 = vmatpush3.bf16.msra.mxu1 %v943_v19  ;;  %v976_v3 = vld [vmem:[%s1163_s3 + $0x18] sm:$0xff]   ;;  %v977_v4 = vld [vmem:[%s1163_s3 + $0x20] sm:$0xff]   ;;  %v978_v5 = vld [vmem:[%s1163_s3 + $0x28] sm:$0xff]  }
  0x28   :  { %847 = vmatprep.subr.bf16.mxu1 %v946_v22  ;;  %v979_v6 = vld [vmem:[%s1163_s3 + $0x30] sm:$0xff]   ;;  %v980_v7 = vld [vmem:[%s1163_s3 + $0x38] sm:$0xff]   ;;  %v755_v9 = vld [vmem:[%s1162_s2] ss:$0 sm:$0xff] }
  0x29   :  { %826 = vmatpush3.bf16.msra.mxu0 %v945_v21  ;;  %v806_v34 = vld [vmem:[%s1164_s4] ss:$0 sm:$0xff]  ;;  %s1038_s4 = smov [#allocation5]  }
  0x2a   :  { %827 = vmatprep.subr.bf16.mxu0 %v948_v24  ;;  %s746_s11 = sshll.u32 %s1038_s4, 4  ;;  %s747_s11 = int_to_ptr.vmem [resolvable:$true] %s746_s11 }
  0x2b   :  { %848 = vmatpush3.bf16.msra.mxu1 %v947_v23  ;;  %s1007_s12 = scalar_lea.vmem %s747_s11, 128  ;;  %p1012_p9 = scmp.lt.s32.totalorder %s747_s11, %s747_s11 }
  0x2c   :  { %849 = vmatprep.subr.bf16.mxu1 %v950_v26  ;;  %p1008_p8 = scmp.ne.s32.totalorder %s747_s11, %s1007_s12  ;;  %p1013_p10 = scmp.lt.s32.totalorder %s1007_s12, %s1007_s12 }
  0x2d   :  { %828 = vmatpush3.bf16.msra.mxu0 %v949_v25 }
  0x2e   :  { %829 = vmatprep.subr.bf16.mxu0 %v952_v28  ;;  %p1014_p11 = por %p1013_p10, %p1012_p9 }
  0x2f   :  { %850 = vmatpush3.bf16.msra.mxu1 %v951_v27 }
  0x30   :  { %851 = vmatprep.subr.bf16.mxu1 %v954_v30  ;;  %p1015_p12 = pnand %p1014_p11, %p1008_p8 }
  0x31   :  { %830 = vmatpush3.bf16.msra.mxu0 %v953_v29 }
  0x32   :  { %859 = vmatprep.subr.bf16.mxu0 %v956_v36 }
  0x33   :  { %852 = vmatpush3.bf16.msra.mxu1 %v955_v33 }
  0x34   :  { %486 = vmatmul.mubr.bf16.vlgmr.msra.gmra.mrb[0].mxu0 %v43_v35  ;;  %892 = vmatprep.subr.bf16.mxu1 %v1036_v44 }
  0x35   :  { %860 = vmatpush3.bf16.msra.mxu0 %v957_v39  ;;  %565 = vmatprep.mubr.bf16.mxu0 %v48_v56 }
  0x36   :  { %526 = vmatmul.mubr.bf16.vlgmr.msra.gmra.mrb[0].mxu1 %v45_v41  ;;  %861 = vmatprep.subr.bf16.mxu0 %v958_v42 }
  0x37   :  { %894 = vmatprep.mubr.msk.bf16.mxu1 %vm1037_vm0, %v1036_v44  ;;  %893 = vmatpush3.bf16.msra.mxu1 %v972_v53 }
  0x38   :  { %898 = vmatprep.subr.bf16.mxu1 %v1036_v44 }
  0x39   :  { %862 = vmatpush3.bf16.msra.mxu0 %v959_v43 }
  0x3a   :  { %863 = vmatprep.subr.bf16.mxu0 %v960_v45 }
  0x3d   :  { %864 = vmatpush3.bf16.msra.mxu0 %v961_v46 }
  0x3e   :  { %865 = vmatprep.subr.bf16.mxu0 %v962_v47  ;;  %895 = vmatmul.mubr.msk.bf16.vlgmr.msra.gmra.mrb[4].mxu1 %vm449_vm1, %v49_v58 }
  0x3f   :  { %914 = vmatprep.mubr.msk.bf16.mxu1 %vm1037_vm0, %v1036_v44  ;;  %899 = vmatpush3.bf16.msra.mxu1 %v973_v0 }
  0x40   :  { %900 = vmatprep.subr.bf16.mxu1 %v1036_v44 }
  0x41   :  { %866 = vmatpush3.bf16.msra.mxu0 %v963_v48 }
  0x42   :  { %867 = vmatprep.subr.bf16.mxu0 %v964_v49 }
  0x43   :  { %901 = vmatpush3.bf16.msra.mxu1 %v974_v1 }
  0x44   :  { %902 = vmatprep.subr.bf16.mxu1 %v1036_v44 }
  0x45   :  { %868 = vmatpush3.bf16.msra.mxu0 %v965_v50 }
  0x46   :  { %869 = vmatprep.subr.bf16.mxu0 %v966_v51 }
  0x47   :  { %903 = vmatpush3.bf16.msra.mxu1 %v975_v2 }
  0x48   :  { %904 = vmatprep.subr.bf16.mxu1 %v1036_v44 }
  0x49   :  { %870 = vmatpush3.bf16.msra.mxu0 %v967_v52 }
  0x4a   :  { %871 = vmatprep.subr.bf16.mxu0 %v968_v55 }
  0x4b   :  { %905 = vmatpush3.bf16.msra.mxu1 %v976_v3 }
  0x4c   :  { %906 = vmatprep.subr.bf16.mxu1 %v1036_v44 }
  0x4d   :  { %872 = vmatpush3.bf16.msra.mxu0 %v969_v59 }
  0x4e   :  { %873 = vmatprep.subr.bf16.mxu0 %v970_v60 }
  0x4f   :  { %907 = vmatpush3.bf16.msra.mxu1 %v977_v4 }
  0x50   :  { %908 = vmatprep.subr.bf16.mxu1 %v1036_v44 }
  0x51   :  { %874 = vmatpush3.bf16.msra.mxu0 %v971_v61 }
  0x53   :  { %909 = vmatpush3.bf16.msra.mxu1 %v978_v5 }
  0x54   :  { %566 = vmatmul.mubr.bf16.vlgmr.msra.gmra.mrb[4].mxu0 %v47_v63  ;;  %910 = vmatprep.subr.bf16.mxu1 %v1036_v44 }
  0x57   :  { %911 = vmatpush3.bf16.msra.mxu1 %v979_v6 }
  0x58   :  { %912 = vmatprep.subr.bf16.mxu1 %v1036_v44 }
  0x5b   :  { %913 = vmatpush3.bf16.msra.mxu1 %v980_v7 }
 0x107   :  { %v831_v8 = vpop.f32.mrb[0].mxu0 }
 0x108   :  { %v832_v10 = vpop.f32.mrb[1].mxu0 }
 0x109   :  { %v833_v11 = vadd.f32 %v832_v10, %v831_v8  ;;  %v834_v12 = vpop.f32.mrb[2].mxu0  ;;  %v853_v13 = vpop.f32.mrb[0].mxu1 }
 0x10a   :  { %v835_v14 = vpop.f32.mrb[3].mxu0  ;;  %v854_v16 = vpop.f32.mrb[1].mxu1 }
 0x10b   :  { %v488_v15 = vadd.f32 %v833_v11, %v755_v9  ;;  %v855_v17 = vadd.f32 %v854_v16, %v853_v13  ;;  %v856_v18 = vpop.f32.mrb[2].mxu1 }
 0x10c   :  { %v857_v19 = vpop.f32.mrb[3].mxu1 }
 0x10d   :  { %v528_v20 = vadd.f32 %v855_v17, %v488_v15 }
 0x111   :  { %v607_v21 = vpop.f32.mrb[4].mxu1 }
 0x112   :  { %v896_v22 = vpop.f32.mrb[5].mxu1 }
 0x113   :  { %v610_v23 = vpop.f32.mrb[6].mxu1 }
 0x114   :  { %v897_v24 = vpop.f32.mrb[7].mxu1 }
 0x127   :  { %v875_v25 = vpop.f32.mrb[4].mxu0 }
 0x128   :  { %v876_v26 = vpop.f32.mrb[5].mxu0 }
 0x129   :  { %v877_v27 = vadd.f32 %v876_v26, %v875_v25  ;;  %v878_v28 = vpop.f32.mrb[6].mxu0 }
 0x12a   :  { %v879_v29 = vpop.f32.mrb[7].mxu0 }
 0x12b   :  { %v568_v30 = vadd.f32 %v877_v27, %v528_v20 }
 0x12d   :  { %v608_v31 = vadd.f32 %v607_v21, %v568_v30 }
 0x12f   :  { %v613_v32 = vmax.f32 %v608_v31, 0.0 }
 0x131   :  { %v614_v33 = vpack.c.bf16 %v613_v32, %v613_v32 }
 0x133   :  { %915 = vmatmul.mubr.bf16.vlgmr.msra.gmra.mrb[8].mxu1 %v614_v33 }
 0x206   :  { %v720_v35 = vpop.f32.mrb[8].mxu1 }
 0x207   :  { %v721_v36 = vadd.f32 %v806_v34, %v720_v35  ;;  %v916_v37 = vpop.f32.mrb[9].mxu1 }
 0x208   :  { %v723_v38 = vpop.f32.mrb[10].mxu1 }
 0x209   :  { %v917_v39 = vpop.f32.mrb[11].mxu1  ;;  %v727_v40 = vsel %vm726_vm2, %v721_v36, -inf }
 0x20a   :  { %728 = vmax.xlane.f32.xlu0 %v727_v40 }
 0x297   :  { %v729_v41 = vpop.xlane.xlu0 %728 }
 0x298   :  { %v730_v42 = vsub.f32 %v721_v36, %v729_v41 }
 0x29a   :  { %v731_v43 = vmul.f32 1.442695, %v730_v42 }
 0x29c   :  { %981 = vpow2.f32 %v731_v43 }
 0x2a6   :  { %v982_v44 = vpop.eup %981 }
 0x2a7   :  { %v733_v45 = vsel %vm726_vm2, %v982_v44, 0.0 }
 0x2a8   :  { %734 = vadd.xlane.f32.xlu0 %v733_v45 }
 0x335   :  { %v735_v46 = vpop.xlane.xlu0 %734 }
 0x336   :  { %983 = vlog2.f32 %v735_v46 }
 0x340   :  { %v984_v47 = vpop.eup %983 }
 0x341   :  { %v737_v48 = vmul.f32 0.6931472, %v984_v47 }
 0x343   :  { %v738_v49 = vsub.f32 %v730_v42, %v737_v48 }
 0x345   :  { %739 = vst.msk [vmem:[#allocation5] sm:$0xff] %vm726_vm2, %v738_v49 }
 0x346   :  { %1018 = shalt.err (!%p1015_p12)
}
 0x347   :  { %s1019_s15 = scalar_lea.hbm %s1165_s5, 128 }
 0x348   :  { %p1020_p13 = scmp.ne.s32.totalorder %s1165_s5, %s1019_s15  ;;  %p1023_p0 = scmp.lt.u32.totalorder %s1019_s15, %s1165_s5 }
 0x34a   :  { %p1025_p1 = pnand %p1023_p0, %p1020_p13 }
 0x34c   :  { %1028 = shalt.err (!%p1025_p1)
}
 0x34d   :  { %749 = dma.vmem_to_hbm [thread:$0]  %s747_s11, 128, %s1165_s5, [#allocation4]  }
 0x34e   :  { %1031 = dma.done.wait [#allocation4], 128  }
 0x34f   :  { %1032 = vsyncadd [#allocation4], 4294967168 }
 0x350   :  { %753 = vsyncpa [#allocation3], 1 }
 0x351   :  { %754 = vsyncpa [#allocation4], 1 }

</bundles_post_ra>
